<compile_context>
chip_gen: v5e
topology: v5e:2x2
jax: 0.10.0
libtpu: 0.0.40
codegen_flags: <defaults>
</compile_context>

<pallas_src>
import jax
import jax.numpy as jnp
from jax.experimental import pallas as pl
from jax.experimental.pallas import tpu as pltpu


# ----------------------------------------------------------------------------
# Fused kernel:  relu(x @ w1 + b1)  --HW-sum-->  acc  --finalize-->  acc @ wc + bc
# ----------------------------------------------------------------------------
def _fused_backbone_head_kernel(x_ref, w1_ref, b1_ref, wc_ref, bc_ref,
                                o_ref, acc_ref):
    t = pl.program_id(0)

    @pl.when(t == 0)
    def _init():
        acc_ref[...] = jnp.zeros_like(acc_ref)
        o_ref[...] = jnp.zeros_like(o_ref)     # guard against early writeback

    xb = x_ref[...]                            # (B, THW, Cin) bf16 tile
    b, thw, cin = xb.shape
    x2d = xb.reshape(b * thw, cin)             # sublane-stack (8-aligned THW)

    # Pointwise conv == matmul on the MXU (bf16 in, f32 accumulate).
    h = jnp.dot(x2d, w1_ref[...], preferred_element_type=jnp.float32)
    h = jnp.maximum(h + b1_ref[...], 0.0)      # bias + ReLU in f32 (VPU)

    # Running per-batch sum over the spatial (HW) dimension (XLU reduce).
    acc_ref[...] += h.reshape(b, thw, -1).sum(axis=1)          # (B, C1)

    @pl.when(t == pl.num_programs(0) - 1)
    def _finalize():
        # acc holds the HW-sum; 1/HW is pre-folded into wc, so this is the
        # classifier applied to the avg-pooled feature.
        o_ref[...] = (
            jnp.dot(acc_ref[...], wc_ref[...], preferred_element_type=jnp.float32)
            + bc_ref[...]
        )


def _choose_hw_tile(batch, hw, cin, bytes_per_elem=2, vmem_budget=8 << 20):
    """Largest HW tile (multiple of 8, dividing HW) whose double-buffered x
    block stays well under a conservative VMEM budget (safe for v7x 64 MiB)."""
    max_rows = max(8, vmem_budget // (2 * batch * max(cin, 1) * bytes_per_elem))
    if hw <= max_rows:
        return hw                       # whole HW in one block (grid of 1)
    upper = (min(hw, max_rows) // 8) * 8
    for t in range(upper, 0, -8):
        if hw % t == 0:
            return t
    return hw                           # fallback: single full block


# ----------------------------------------------------------------------------
# Parameter initialization (deterministic, synthetic pointwise-conv backbone)
# ----------------------------------------------------------------------------
def init_params(key, cin=4, c1=32, c2=48, c3=64, num_class=10):
    k1, k2, k3, kc = jax.random.split(key, 4)

    def glorot(k, fan_in, fan_out):
        scale = jnp.sqrt(2.0 / (fan_in + fan_out))
        return jax.random.normal(k, (fan_in, fan_out), jnp.float32) * scale

    return {
        # Synthetic model_func(): three pointwise-conv stages. Stages 2/3 are
        # kept for structural fidelity but never consumed by the protonet
        # head (see forward), so they are not computed.
        "w1": glorot(k1, cin, c1), "b1": jnp.zeros((1, c1), jnp.float32),
        "w2": glorot(k2, c1, c2),  "b2": jnp.zeros((1, c2), jnp.float32),
        "w3": glorot(k3, c2, c3),  "b3": jnp.zeros((1, c3), jnp.float32),
        # classifier: Linear(feat_dim[0] == c1, num_class), bias.fill_(0)
        "wc": glorot(kc, c1, num_class),
        "bc": jnp.zeros((1, num_class), jnp.float32),
    }


# ----------------------------------------------------------------------------
# BaselineTrain.forward (method == 'protonet', dataset != 'cub')
# ----------------------------------------------------------------------------
@jax.jit
def baseline_train_forward(params, x_nchw):
    B, C, H, W = x_nchw.shape
    HW = H * W
    C1 = params["w1"].shape[1]
    num_class = params["wc"].shape[1]
    nc_pad = max(128, ((num_class + 127) // 128) * 128)   # lane-dense output

    # NCHW -> NHWC -> (B, HW, Cin); bf16 halves HBM traffic into the kernel.
    x = jnp.transpose(x_nchw, (0, 2, 3, 1)).reshape(B, HW, C).astype(jnp.bfloat16)
    w1 = params["w1"].astype(jnp.bfloat16)
    b1 = params["b1"]                                       # f32 epilogue

    # Fold 1/HW (the adaptive-avg-pool) into the classifier weights and pad
    # the class dimension to 128 lanes (unmasked stores inside the kernel).
    wc_s = jnp.zeros((C1, nc_pad), jnp.float32).at[:, :num_class].set(
        params["wc"] / jnp.float32(HW))
    bc_p = jnp.zeros((1, nc_pad), jnp.float32).at[:, :num_class].set(params["bc"])

    thw = _choose_hw_tile(B, HW, C)
    grid = (HW // thw,)

    scores_pad = pl.pallas_call(
        _fused_backbone_head_kernel,
        out_shape=jax.ShapeDtypeStruct((B, nc_pad), jnp.float32),
        grid=grid,
        in_specs=[
            pl.BlockSpec((B, thw, C), lambda t: (0, t, 0)),     # x tile over HW
            pl.BlockSpec((C, C1), lambda t: (0, 0)),            # w1 (resident)
            pl.BlockSpec((1, C1), lambda t: (0, 0)),            # b1 (resident)
            pl.BlockSpec((C1, nc_pad), lambda t: (0, 0)),       # wc/HW (resident)
            pl.BlockSpec((1, nc_pad), lambda t: (0, 0)),        # bc (resident)
        ],
        out_specs=pl.BlockSpec((B, nc_pad), lambda t: (0, 0)),  # resident, write last
        scratch_shapes=[pltpu.VMEM((B, C1), jnp.float32)],      # HW-sum accumulator
        compiler_params=pltpu.CompilerParams(
            dimension_semantics=("arbitrary",)),                # reduction axis
    )(x, w1, b1, wc_s, bc_p)

    scores = scores_pad[:, :num_class]
    # protonet: scores1 == scores2 == scores3 == classifier(avgpool(out1)).
    # out2/out3 backbone stages are dead work in this branch and are skipped.
    return scores, scores, scores


if __name__ == "__main__":
    key = jax.random.PRNGKey(0)
    kx, kp = jax.random.split(key)

    B, C, H, W = 2, 4, 16, 16
    num_class = 10
    x = jax.random.normal(kx, (B, C, H, W), jnp.float32)   # NCHW, like PyTorch
    params = init_params(kp, cin=C, num_class=num_class)

    s1, s2, s3 = baseline_train_forward(params, x)
    jax.block_until_ready((s1, s2, s3))

    assert s1.shape == (B, num_class)
    assert s2.shape == (B, num_class)
    assert s3.shape == (B, num_class)
    assert bool(jnp.all(jnp.isfinite(s1)))
    print("KERNEL_OK")
</pallas_src>

<mosaic_0001>
module attributes {stable_mosaic.version = 11 : i64} {
  func.func @_fused_backbone_head_kernel(%arg0: i32, %arg1: memref<2x256x4xbf16, #tpu.memory_space<vmem>>, %arg2: memref<4x32xbf16, #tpu.memory_space<vmem>>, %arg3: memref<1x32xf32, #tpu.memory_space<vmem>>, %arg4: memref<32x128xf32, #tpu.memory_space<vmem>>, %arg5: memref<1x128xf32, #tpu.memory_space<vmem>>, %arg6: memref<2x128xf32, #tpu.memory_space<vmem>>, %arg7: memref<2x32xf32, #tpu.memory_space<vmem>>) attributes {dimension_semantics = [#tpu.dimension_semantics<arbitrary>], iteration_bounds = array<i64: 1>, scalar_prefetch = 0 : i64, scratch_operands = 1 : i64, tpu.core_type = #tpu.core_type<tc>, window_params = [{transform_indices = @transform_0, window_bounds = array<i64: 2, 256, 4>}, {pipeline_mode = #tpu.pipeline_mode<synchronous>, transform_indices = @transform_1, window_bounds = array<i64: 4, 32>}, {pipeline_mode = #tpu.pipeline_mode<synchronous>, transform_indices = @transform_2, window_bounds = array<i64: 1, 32>}, {pipeline_mode = #tpu.pipeline_mode<synchronous>, transform_indices = @transform_3, window_bounds = array<i64: 32, 128>}, {pipeline_mode = #tpu.pipeline_mode<synchronous>, transform_indices = @transform_4, window_bounds = array<i64: 1, 128>}, {pipeline_mode = #tpu.pipeline_mode<synchronous>, transform_indices = @transform_5, window_bounds = array<i64: 2, 128>}]} {
    %c0_i32 = arith.constant 0 : i32
    %0 = arith.cmpi eq, %arg0, %c0_i32 : i32
    %1 = arith.extui %0 : i1 to i32
    %c0_i32_0 = arith.constant 0 : i32
    %2 = arith.cmpi ne, %1, %c0_i32_0 : i32
    scf.if %2 {
      %cst_15 = arith.constant 0.000000e+00 : f32
      %20 = vector.broadcast %cst_15 : f32 to vector<2x32xf32>
      %c0_16 = arith.constant 0 : index
      %c0_17 = arith.constant 0 : index
      %21 = vector.load %arg7[%c0_16, %c0_17] : memref<2x32xf32, #tpu.memory_space<vmem>>, vector<2x32xf32>
      tpu.vector_store %arg7[%c0_16, %c0_17], %20 {strides = array<i32>} : memref<2x32xf32, #tpu.memory_space<vmem>>, vector<2x32xf32>,
      %cst_18 = arith.constant 0.000000e+00 : f32
      %22 = vector.broadcast %cst_18 : f32 to vector<2x128xf32>
      %c0_19 = arith.constant 0 : index
      %c0_20 = arith.constant 0 : index
      %23 = vector.load %arg6[%c0_19, %c0_20] : memref<2x128xf32, #tpu.memory_space<vmem>>, vector<2x128xf32>
      tpu.vector_store %arg6[%c0_19, %c0_20], %22 {strides = array<i32>} : memref<2x128xf32, #tpu.memory_space<vmem>>, vector<2x128xf32>,
    } else {
    }
    %c0 = arith.constant 0 : index
    %c0_1 = arith.constant 0 : index
    %c0_2 = arith.constant 0 : index
    %3 = vector.load %arg1[%c0, %c0_1, %c0_2] : memref<2x256x4xbf16, #tpu.memory_space<vmem>>, vector<2x256x4xbf16>
    %4 = vector.shape_cast %3 : vector<2x256x4xbf16> to vector<512x4xbf16>
    %c0_3 = arith.constant 0 : index
    %c0_4 = arith.constant 0 : index
    %5 = vector.load %arg2[%c0_3, %c0_4] : memref<4x32xbf16, #tpu.memory_space<vmem>>, vector<4x32xbf16>
    %cst = arith.constant dense<0.000000e+00> : vector<512x32xf32>
    %6 = tpu.matmul %4, %5, %cst {dimension_numbers = #tpu.dot_dimension_numbers<[1], [0], [0], [1], [0, 0, 1, 1], [], []>} : vector<512x4xbf16>, vector<4x32xbf16>, vector<512x32xf32> -> vector<512x32xf32>
    %c0_5 = arith.constant 0 : index
    %c0_6 = arith.constant 0 : index
    %7 = vector.load %arg3[%c0_5, %c0_6] : memref<1x32xf32, #tpu.memory_space<vmem>>, vector<1x32xf32>
    %8 = vector.broadcast %7 : vector<1x32xf32> to vector<512x32xf32>
    %9 = arith.addf %6, %8 : vector<512x32xf32>
    %cst_7 = arith.constant 0.000000e+00 : f32
    %10 = vector.broadcast %cst_7 : f32 to vector<512x32xf32>
    %11 = arith.maximumf %9, %10 : vector<512x32xf32>
    %c0_8 = arith.constant 0 : index
    %c0_9 = arith.constant 0 : index
    %12 = vector.load %arg7[%c0_8, %c0_9] : memref<2x32xf32, #tpu.memory_space<vmem>>, vector<2x32xf32>
    %13 = vector.shape_cast %11 : vector<512x32xf32> to vector<2x256x32xf32>
    %cst_10 = arith.constant dense<0.000000e+00> : vector<2x32xf32>
    %14 = vector.multi_reduction <add>, %13, %cst_10 [1] : vector<2x256x32xf32> to vector<2x32xf32>
    %15 = arith.addf %12, %14 : vector<2x32xf32>
    %c0_11 = arith.constant 0 : index
    %c0_12 = arith.constant 0 : index
    %16 = vector.load %arg7[%c0_11, %c0_12] : memref<2x32xf32, #tpu.memory_space<vmem>>, vector<2x32xf32>
    tpu.vector_store %arg7[%c0_11, %c0_12], %15 {strides = array<i32>} : memref<2x32xf32, #tpu.memory_space<vmem>>, vector<2x32xf32>,
    %c0_i32_13 = arith.constant 0 : i32
    %17 = arith.cmpi eq, %arg0, %c0_i32_13 : i32
    %18 = arith.extui %17 : i1 to i32
    %c0_i32_14 = arith.constant 0 : i32
    %19 = arith.cmpi ne, %18, %c0_i32_14 : i32
    scf.if %19 {
      %c0_15 = arith.constant 0 : index
      %c0_16 = arith.constant 0 : index
      %20 = vector.load %arg7[%c0_15, %c0_16] : memref<2x32xf32, #tpu.memory_space<vmem>>, vector<2x32xf32>
      %c0_17 = arith.constant 0 : index
      %c0_18 = arith.constant 0 : index
      %21 = vector.load %arg4[%c0_17, %c0_18] : memref<32x128xf32, #tpu.memory_space<vmem>>, vector<32x128xf32>
      %cst_19 = arith.constant dense<0.000000e+00> : vector<2x128xf32>
      %22 = tpu.matmul %20, %21, %cst_19 {dimension_numbers = #tpu.dot_dimension_numbers<[1], [0], [0], [1], [0, 0, 1, 1], [], []>} : vector<2x32xf32>, vector<32x128xf32>, vector<2x128xf32> -> vector<2x128xf32>
      %c0_20 = arith.constant 0 : index
      %c0_21 = arith.constant 0 : index
      %23 = vector.load %arg5[%c0_20, %c0_21] : memref<1x128xf32, #tpu.memory_space<vmem>>, vector<1x128xf32>
      %24 = vector.broadcast %23 : vector<1x128xf32> to vector<2x128xf32>
      %25 = arith.addf %22, %24 : vector<2x128xf32>
      %c0_22 = arith.constant 0 : index
      %c0_23 = arith.constant 0 : index
      %26 = vector.load %arg6[%c0_22, %c0_23] : memref<2x128xf32, #tpu.memory_space<vmem>>, vector<2x128xf32>
      tpu.vector_store %arg6[%c0_22, %c0_23], %25 {strides = array<i32>} : memref<2x128xf32, #tpu.memory_space<vmem>>, vector<2x128xf32>,
    } else {
    }
    return
  }
  func.func @transform_0(%arg0: i32) -> (i32, i32, i32) {
    %c0_i32 = arith.constant 0 : i32
    %c0_i32_0 = arith.constant 0 : i32
    %c0_i32_1 = arith.constant 0 : i32
    return %c0_i32, %arg0, %c0_i32_0 : i32, i32, i32
  }
  func.func @transform_1(%arg0: i32) -> (i32, i32) {
    %c0_i32 = arith.constant 0 : i32
    %c0_i32_0 = arith.constant 0 : i32
    %c0_i32_1 = arith.constant 0 : i32
    return %c0_i32, %c0_i32_0 : i32, i32
  }
  func.func @transform_2(%arg0: i32) -> (i32, i32) {
    %c0_i32 = arith.constant 0 : i32
    %c0_i32_0 = arith.constant 0 : i32
    %c0_i32_1 = arith.constant 0 : i32
    return %c0_i32, %c0_i32_0 : i32, i32
  }
  func.func @transform_3(%arg0: i32) -> (i32, i32) {
    %c0_i32 = arith.constant 0 : i32
    %c0_i32_0 = arith.constant 0 : i32
    %c0_i32_1 = arith.constant 0 : i32
    return %c0_i32, %c0_i32_0 : i32, i32
  }
  func.func @transform_4(%arg0: i32) -> (i32, i32) {
    %c0_i32 = arith.constant 0 : i32
    %c0_i32_0 = arith.constant 0 : i32
    %c0_i32_1 = arith.constant 0 : i32
    return %c0_i32, %c0_i32_0 : i32, i32
  }
  func.func @transform_5(%arg0: i32) -> (i32, i32) {
    %c0_i32 = arith.constant 0 : i32
    %c0_i32_0 = arith.constant 0 : i32
    %c0_i32_1 = arith.constant 0 : i32
    return %c0_i32, %c0_i32_0 : i32, i32
  }
}

</mosaic_0001>

<bundles_post_ra>
// kernel: baseline_train_forward.1
= control target key start
LH: loop header
LB: loop body
LE: loop exit
PB: predicated region body
PF: predicated region fallthrough
CT: control target
= control target key end

     0   :  { %vm354_vm0 = vcmask 1041408   ;;  %vm257_vm1 = vcmask 31744   ;;  %vm592_vm2 = vcmask 261120   ;;  %vm25_vm3 = vcmask 254976   ;;  %s1384_s1 = inlined_call_operand.vmem [shape: bf16[4,32], index: 1, kind: input, shape index: {}]   ;;  %s1385_s0 = inlined_call_operand.vmem [shape: bf16[2,256,4], index: 0, kind: input, shape index: {}]   ;;  %s1386_s2 = inlined_call_operand.vmem [shape: f32[1,32], index: 2, kind: input, shape index: {}]   ;;  %s1387_s4 = inlined_call_operand.vmem [shape: f32[1,128], index: 4, kind: input, shape index: {}]   ;;  %s1388_s3 = inlined_call_operand.vmem [shape: f32[32,128], index: 3, kind: input, shape index: {}]   ;;  %s1389_s5 = inlined_call_operand.vmem [shape: f32[2,128], index: 5, kind: output, shape index: {}]  }
   0x1   :  { %v92_v0 = vld [vmem:[%s1384_s1] sm:$0x3]  ;;  %v954_v3 = vld [vmem:[%s1385_s0 + $0x70] sm:$0xff]  ;;  %v963_v4 = vld [vmem:[%s1385_s0 + $0xb8] sm:$0xff]  ;;  %vm733_vm4 = vcmask 1041409  }
   0x2   :  { %v356_v1 = vsel %vm354_vm0, %v92_v0, 0  ;;  %v940_v2 = vld [vmem:[%s1385_s0] sm:$0xff]  ;;  %v941_v5 = vld [vmem:[%s1385_s0 + $0x8] sm:$0xff]  ;;  %v955_v6 = vld [vmem:[%s1385_s0 + $0x78] sm:$0xff] }
   0x3   :  { %365 = vmatpush.bf16.msra.mxu0 %v356_v1  ;;  %973 = vmatpush.bf16.msra.mxu2 %v356_v1  ;;  %v964_v7 = vld [vmem:[%s1385_s0 + $0xc0] sm:$0xff]  ;;  %v942_v8 = vld [vmem:[%s1385_s0 + $0x10] sm:$0xff]  ;;  %v965_v10 = vld [vmem:[%s1385_s0 + $0xc8] sm:$0xff] }
   0x4   :  { %974 = vmatpush.bf16.msra.mxu3 %v356_v1  ;;  %972 = vmatpush.bf16.msra.mxu1 %v356_v1  ;;  %v956_v9 = vld [vmem:[%s1385_s0 + $0x80] sm:$0xff]  ;;  %v943_v11 = vld [vmem:[%s1385_s0 + $0x18] sm:$0xff]  ;;  %v957_v12 = vld [vmem:[%s1385_s0 + $0x88] sm:$0xff] }
   0x5   :  { %v966_v13 = vld [vmem:[%s1385_s0 + $0xd0] sm:$0xff]  ;;  %v949_v14 = vld [vmem:[%s1385_s0 + $0x48] sm:$0xff]  ;;  %v944_v15 = vld [vmem:[%s1385_s0 + $0x20] sm:$0xff] }
   0x6   :  { %907 = vmatmul.msk.bf16.vlgmr.msra.gmra.mxu0 %vm257_vm1, %v940_v2  ;;  %921 = vmatmul.msk.bf16.vlgmr.msra.gmra.mxu2 %vm257_vm1, %v954_v3  ;;  %v958_v16 = vld [vmem:[%s1385_s0 + $0x90] sm:$0xff]  ;;  %v967_v17 = vld [vmem:[%s1385_s0 + $0xd8] sm:$0xff]  ;;  %v945_v19 = vld [vmem:[%s1385_s0 + $0x28] sm:$0xff] }
   0x7   :  { %930 = vmatmul.msk.bf16.vlgmr.msra.gmra.mxu3 %vm257_vm1, %v963_v4  ;;  %916 = vmatmul.msk.bf16.vlgmr.msra.gmra.mxu1 %vm257_vm1, %v949_v14  ;;  %v950_v18 = vld [vmem:[%s1385_s0 + $0x50] sm:$0xff]  ;;  %v959_v20 = vld [vmem:[%s1385_s0 + $0x98] sm:$0xff]  ;;  %v968_v21 = vld [vmem:[%s1385_s0 + $0xe0] sm:$0xff] }
   0x8   :  { %v951_v22 = vld [vmem:[%s1385_s0 + $0x58] sm:$0xff]  ;;  %v946_v23 = vld [vmem:[%s1385_s0 + $0x30] sm:$0xff]  ;;  %v960_v24 = vld [vmem:[%s1385_s0 + $0xa0] sm:$0xff] }
   0x9   :  { %v969_v25 = vld [vmem:[%s1385_s0 + $0xe8] sm:$0xff]  ;;  %v952_v26 = vld [vmem:[%s1385_s0 + $0x60] sm:$0xff]  ;;  %v947_v27 = vld [vmem:[%s1385_s0 + $0x38] sm:$0xff] }
   0xa   :  { %v961_v28 = vld [vmem:[%s1385_s0 + $0xa8] sm:$0xff]  ;;  %v970_v29 = vld [vmem:[%s1385_s0 + $0xf0] sm:$0xff]  ;;  %v948_v31 = vld [vmem:[%s1385_s0 + $0x40] sm:$0xff] }
   0xb   :  { %v953_v30 = vld [vmem:[%s1385_s0 + $0x68] sm:$0xff]  ;;  %v962_v32 = vld [vmem:[%s1385_s0 + $0xb0] sm:$0xff]  ;;  %v971_v34 = vld [vmem:[%s1385_s0 + $0xf8] sm:$0xff] }
   0xc   :  { %v1140_v35 = vld [vmem:[%s1386_s2] ss:$0 sm:$0xff] }
  0x16   :  { %908 = vmatmul.msk.bf16.gmra.mxu0 %vm257_vm1, %v941_v5  ;;  %922 = vmatmul.msk.bf16.gmra.mxu2 %vm257_vm1, %v955_v6 }
  0x17   :  { %931 = vmatmul.msk.bf16.gmra.mxu3 %vm257_vm1, %v964_v7  ;;  %917 = vmatmul.msk.bf16.gmra.mxu1 %vm257_vm1, %v950_v18 }
  0x26   :  { %909 = vmatmul.msk.bf16.gmra.mxu0 %vm257_vm1, %v942_v8  ;;  %923 = vmatmul.msk.bf16.gmra.mxu2 %vm257_vm1, %v956_v9 }
  0x27   :  { %932 = vmatmul.msk.bf16.gmra.mxu3 %vm257_vm1, %v965_v10  ;;  %918 = vmatmul.msk.bf16.gmra.mxu1 %vm257_vm1, %v951_v22 }
  0x36   :  { %910 = vmatmul.msk.bf16.gmra.mxu0 %vm257_vm1, %v943_v11  ;;  %924 = vmatmul.msk.bf16.gmra.mxu2 %vm257_vm1, %v957_v12 }
  0x37   :  { %933 = vmatmul.msk.bf16.gmra.mxu3 %vm257_vm1, %v966_v13  ;;  %919 = vmatmul.msk.bf16.gmra.mxu1 %vm257_vm1, %v952_v26 }
  0x46   :  { %911 = vmatmul.msk.bf16.gmra.mxu0 %vm257_vm1, %v944_v15  ;;  %925 = vmatmul.msk.bf16.gmra.mxu2 %vm257_vm1, %v958_v16 }
  0x47   :  { %934 = vmatmul.msk.bf16.gmra.mxu3 %vm257_vm1, %v967_v17  ;;  %920 = vmatmul.msk.bf16.gmra.mxu1 %vm257_vm1, %v953_v30 }
  0x56   :  { %912 = vmatmul.msk.bf16.gmra.mxu0 %vm257_vm1, %v945_v19  ;;  %926 = vmatmul.msk.bf16.gmra.mxu2 %vm257_vm1, %v959_v20 }
  0x57   :  { %935 = vmatmul.msk.bf16.gmra.mxu3 %vm257_vm1, %v968_v21 }
  0x66   :  { %913 = vmatmul.msk.bf16.gmra.mxu0 %vm257_vm1, %v946_v23  ;;  %927 = vmatmul.msk.bf16.gmra.mxu2 %vm257_vm1, %v960_v24 }
  0x67   :  { %936 = vmatmul.msk.bf16.gmra.mxu3 %vm257_vm1, %v969_v25 }
  0x76   :  { %914 = vmatmul.msk.bf16.gmra.mxu0 %vm257_vm1, %v947_v27  ;;  %928 = vmatmul.msk.bf16.gmra.mxu2 %vm257_vm1, %v961_v28 }
  0x77   :  { %937 = vmatmul.msk.bf16.gmra.mxu3 %vm257_vm1, %v970_v29 }
  0x83   :  { %v367_v33 = vpop.f32.mrf.mxu0 }
  0x84   :  { %v368_v36 = vadd.f32 %v1140_v35, %v367_v33  ;;  %v1184_v28 = vpop.f32.mrf.mxu1 }
  0x86   :  { %915 = vmatmul.msk.bf16.gmra.mxu0 %vm257_vm1, %v948_v31  ;;  %929 = vmatmul.msk.bf16.gmra.mxu2 %vm257_vm1, %v962_v32  ;;  %v527_v38 = vmax.f32 %v368_v36, 0.0 }
  0x87   :  { %938 = vmatmul.msk.bf16.gmra.mxu3 %vm257_vm1, %v971_v34 }
  0x88   :  { %v593_v42 = vsel %vm592_vm2, %v527_v38, 0.0 }
  0x89   :  { %v1146_v37 = vpop.f32.mrf.mxu2 }
  0x8a   :  { %v1148_v39 = vpop.f32.mrf.mxu3 }
  0x8b   :  { %v369_v40 = vpop.f32.mrf.mxu0 }
  0x8c   :  { %v370_v41 = vadd.f32 %v1140_v35, %v369_v40  ;;  %v1191_v34 = vpop.f32.mrf.mxu1 }
  0x8e   :  { %v528_v43 = vmax.f32 %v370_v41, 0.0 }
  0x90   :  { %v594_v44 = vsel %vm592_vm2, %v528_v43, 0.0 }
  0x91   :  { %v595_v45 = vadd.f32 %v594_v44, %v593_v42  ;;  %v1153_v46 = vpop.f32.mrf.mxu2 }
  0x92   :  { %v1155_v47 = vpop.f32.mrf.mxu3 }
  0x93   :  { %v372_v48 = vpop.f32.mrf.mxu0 }
  0x94   :  { %v373_v49 = vadd.f32 %v1140_v35, %v372_v48  ;;  %v1195_v42 = vpop.f32.mrf.mxu1 }
  0x96   :  { %v529_v50 = vmax.f32 %v373_v49, 0.0 }
  0x98   :  { %v596_v51 = vsel %vm592_vm2, %v529_v50, 0.0 }
  0x99   :  { %v597_v52 = vadd.f32 %v596_v51, %v595_v45  ;;  %v1159_v53 = vpop.f32.mrf.mxu2 }
  0x9a   :  { %v1161_v54 = vpop.f32.mrf.mxu3 }
  0x9b   :  { %v374_v55 = vpop.f32.mrf.mxu0 }
  0x9c   :  { %v375_v56 = vadd.f32 %v1140_v35, %v374_v55  ;;  %v1199_v49 = vpop.f32.mrf.mxu1 }
  0x9e   :  { %v530_v57 = vmax.f32 %v375_v56, 0.0 }
  0xa0   :  { %v598_v58 = vsel %vm592_vm2, %v530_v57, 0.0 }
  0xa1   :  { %v599_v59 = vadd.f32 %v598_v58, %v597_v52  ;;  %v1165_v60 = vpop.f32.mrf.mxu2  ;;  %v746_v58 = vld [vmem:[%s1388_s3 + $0x18] sm:$0xff] }
  0xa2   :  { %v1167_v62 = vpop.f32.mrf.mxu3  ;;  %766 = vmatpush.msrb.mxu1 %v746_v58 }
  0xa3   :  { %v377_v61 = vpop.f32.mrf.mxu0 }
  0xa4   :  { %v378_v63 = vadd.f32 %v1140_v35, %v377_v61  ;;  %v1203_v55 = vpop.f32.mrf.mxu1 }
  0xa6   :  { %v531_v0 = vmax.f32 %v378_v63, 0.0 }
  0xa8   :  { %v600_v1 = vsel %vm592_vm2, %v531_v0, 0.0 }
  0xa9   :  { %v601_v2 = vadd.f32 %v600_v1, %v599_v59  ;;  %v447_v3 = vpop.f32.mrf.mxu2 }
  0xaa   :  { %v1172_v6 = vpop.f32.mrf.mxu3  ;;  %v448_v7 = vadd.f32 %v1140_v35, %v447_v3 }
  0xab   :  { %v379_v4 = vpop.f32.mrf.mxu0 }
  0xac   :  { %v380_v5 = vadd.f32 %v1140_v35, %v379_v4  ;;  %v559_v12 = vmax.f32 %v448_v7, 0.0  ;;  %v1210_v61 = vpop.f32.mrf.mxu1 }
  0xae   :  { %v532_v8 = vmax.f32 %v380_v5, 0.0  ;;  %v662_v17 = vsel %vm592_vm2, %v559_v12, 0.0 }
  0xb0   :  { %v602_v9 = vsel %vm592_vm2, %v532_v8, 0.0 }
  0xb1   :  { %v603_v10 = vadd.f32 %v602_v9, %v601_v2  ;;  %v449_v11 = vpop.f32.mrf.mxu2 }
  0xb2   :  { %v450_v13 = vadd.f32 %v1140_v35, %v449_v11  ;;  %v1180_v21 = vpop.f32.mrf.mxu3 }
  0xb3   :  { %v382_v14 = vpop.f32.mrf.mxu0 }
  0xb4   :  { %v560_v15 = vmax.f32 %v450_v13, 0.0  ;;  %v383_v16 = vadd.f32 %v1140_v35, %v382_v14  ;;  %v1220_v12 = vpop.f32.mrf.mxu1 }
  0xb6   :  { %v663_v18 = vsel %vm592_vm2, %v560_v15, 0.0  ;;  %v533_v19 = vmax.f32 %v383_v16, 0.0 }
  0xb7   :  { %v664_v20 = vadd.f32 %v663_v18, %v662_v17 }
  0xb8   :  { %v604_v22 = vsel %vm592_vm2, %v533_v19, 0.0 }
  0xb9   :  { %v605_v23 = vadd.f32 %v604_v22, %v603_v10  ;;  %v452_v24 = vpop.f32.mrf.mxu2 }
  0xba   :  { %v453_v25 = vadd.f32 %v1140_v35, %v452_v24  ;;  %v1189_v32 = vpop.f32.mrf.mxu3 }
  0xbb   :  { %v384_v26 = vpop.f32.mrf.mxu0 }
  0xbc   :  { %v561_v27 = vmax.f32 %v453_v25, 0.0  ;;  %v385_v0 = vadd.f32 %v1140_v35, %v384_v26 }
  0xbe   :  { %v665_v29 = vsel %vm592_vm2, %v561_v27, 0.0  ;;  %v534_v4 = vmax.f32 %v385_v0, 0.0 }
  0xbf   :  { %v1187_v30 = vadd.f32 %v665_v29, %v664_v20 }
  0xc0   :  { %v606_v13 = vsel %vm592_vm2, %v534_v4, 0.0 }
  0xc1   :  { %v454_v31 = vpop.f32.mrf.mxu2  ;;  %v607_v24 = vadd.f32 %v606_v13, %v605_v23 }
  0xc2   :  { %v1193_v40 = vpop.f32.mrf.mxu3  ;;  %v455_v7 = vadd.f32 %v1140_v35, %v454_v31 }
  0xc3   :  { %v387_v33 = vpop.f32.mrf.mxu0 }
  0xc4   :  { %v388_v3 = vadd.f32 %v1140_v35, %v387_v33  ;;  %v562_v18 = vmax.f32 %v455_v7, 0.0 }
  0xc6   :  { %v535_v8 = vmax.f32 %v388_v3, 0.0 }
  0xc8   :  { %v608_v19 = vsel %vm592_vm2, %v535_v8, 0.0 }
  0xc9   :  { %v457_v36 = vpop.f32.mrf.mxu2 }
  0xca   :  { %v1197_v44 = vpop.f32.mrf.mxu3  ;;  %v458_v10 = vadd.f32 %v1140_v35, %v457_v36  ;;  %v609_v36 = vadd.f32 %v608_v19, %v607_v24 }
  0xcb   :  { %v389_v38 = vpop.f32.mrf.mxu0 }
  0xcc   :  { %v390_v5 = vadd.f32 %v1140_v35, %v389_v38  ;;  %v563_v25 = vmax.f32 %v458_v10, 0.0 }
  0xce   :  { %v536_v14 = vmax.f32 %v390_v5, 0.0 }
  0xd0   :  { %v610_v29 = vsel %vm592_vm2, %v536_v14, 0.0 }
  0xd1   :  { %v459_v41 = vpop.f32.mrf.mxu2  ;;  %v611_v58 = vadd.f32 %v610_v29, %v609_v36 }
  0xd2   :  { %v1201_v50 = vpop.f32.mrf.mxu3  ;;  %v460_v16 = vadd.f32 %v1140_v35, %v459_v41 }
  0xd3   :  { %v392_v43 = vpop.f32.mrf.mxu0 }
  0xd4   :  { %v393_v9 = vadd.f32 %v1140_v35, %v392_v43  ;;  %v564_v38 = vmax.f32 %v460_v16, 0.0  ;;  %v667_v43 = vsel %vm592_vm2, %v562_v18, 0.0 }
  0xd6   :  { %v537_v20 = vmax.f32 %v393_v9, 0.0  ;;  %v671_v8 = vsel %vm592_vm2, %v564_v38, 0.0 }
  0xd9   :  { %v462_v45 = vpop.f32.mrf.mxu2 }
  0xda   :  { %v1205_v57 = vpop.f32.mrf.mxu3  ;;  %v463_v26 = vadd.f32 %v1140_v35, %v462_v45  ;;  %v669_v45 = vsel %vm592_vm2, %v563_v25, 0.0 }
  0xdb   :  { %v394_v48 = vpop.f32.mrf.mxu0 }
  0xdc   :  { %v395_v15 = vadd.f32 %v1140_v35, %v394_v48  ;;  %v612_v48 = vsel %vm592_vm2, %v537_v20, 0.0  ;;  %v565_v0 = vmax.f32 %v463_v26, 0.0 }
  0xdd   :  { %v613_v9 = vadd.f32 %v612_v48, %v611_v58 }
  0xde   :  { %v538_v31 = vmax.f32 %v395_v15, 0.0  ;;  %v673_v19 = vsel %vm592_vm2, %v565_v0, 0.0 }
  0xe0   :  { %v614_v4 = vsel %vm592_vm2, %v538_v31, 0.0 }
  0xe1   :  { %v464_v51 = vpop.f32.mrf.mxu2 }
  0xe2   :  { %v1213_v2 = vpop.f32.mrf.mxu3  ;;  %v465_v41 = vadd.f32 %v1140_v35, %v464_v51  ;;  %v668_v51 = vadd.f32 %v667_v43, %v1187_v30  ;;  %v413_v43 = vadd.f32 %v1140_v35, %v1184_v28 }
  0xe3   :  { %v397_v52 = vpop.f32.mrf.mxu0 }
  0xe4   :  { %v398_v22 = vadd.f32 %v1140_v35, %v397_v52  ;;  %v566_v10 = vmax.f32 %v465_v41, 0.0  ;;  %v483_v41 = vadd.f32 %v1140_v35, %v1148_v39 }
  0xe6   :  { %v539_v52 = vmax.f32 %v398_v22, 0.0  ;;  %v675_v26 = vsel %vm592_vm2, %v566_v10, 0.0 }
  0xe8   :  { %v616_v14 = vsel %vm592_vm2, %v539_v52, 0.0 }
  0xe9   :  { %v467_v56 = vpop.f32.mrf.mxu2 }
  0xea   :  { %v1228_v27 = vpop.f32.mrf.mxu3 }
  0xeb   :  { %v399_v59 = vpop.f32.mrf.mxu0 }
  0xec   :  { %v400_v33 = vadd.f32 %v1140_v35, %v399_v59  ;;  %v468_v59 = vadd.f32 %v1140_v35, %v467_v56  ;;  %v670_v56 = vadd.f32 %v669_v45, %v668_v51 }
  0xee   :  { %v540_v5 = vmax.f32 %v400_v33, 0.0  ;;  %v567_v20 = vmax.f32 %v468_v59, 0.0  ;;  %v672_v25 = vadd.f32 %v671_v8, %v670_v56 }
  0xf0   :  { %v618_v30 = vsel %vm592_vm2, %v540_v5, 0.0 }
  0xf1   :  { %v469_v63 = vpop.f32.mrf.mxu2 }
  0xf2   :  { %v470_v15 = vadd.f32 %v1140_v35, %v469_v63  ;;  %v1251_v31 = vpop.f32.mrf.mxu3 }
  0xf3   :  { %v402_v1 = vpop.f32.mrf.mxu0 }
  0xf4   :  { %v403_v23 = vadd.f32 %v1140_v35, %v402_v1  ;;  %v1242_v1 = vpop.f32.mrf.mxu1  ;;  %v568_v63 = vmax.f32 %v470_v15, 0.0 }
  0xf6   :  { %v541_v16 = vmax.f32 %v403_v23, 0.0  ;;  %v677_v23 = vsel %vm592_vm2, %v567_v20, 0.0  ;;  %v679_v28 = vsel %vm592_vm2, %v568_v63, 0.0 }
  0xf8   :  { %v620_v33 = vsel %vm592_vm2, %v541_v16, 0.0 }
  0xf9   :  { %v472_v11 = vpop.f32.mrf.mxu2 }
  0xfa   :  { %v473_v22 = vadd.f32 %v1140_v35, %v472_v11  ;;  %v674_v11 = vadd.f32 %v673_v19, %v672_v25  ;;  %v488_v25 = vadd.f32 %v1140_v35, %v1161_v54  ;;  %v490_v54 = vadd.f32 %v1140_v35, %v1167_v62 }
  0xfb   :  { %v404_v17 = vpop.f32.mrf.mxu0 }
  0xfc   :  { %v405_v7 = vadd.f32 %v1140_v35, %v404_v17  ;;  %v615_v17 = vadd.f32 %v614_v4, %v613_v9  ;;  %v569_v45 = vmax.f32 %v473_v22, 0.0  ;;  %v415_v4 = vadd.f32 %v1140_v35, %v1191_v34 }
  0xfd   :  { %v676_v39 = vadd.f32 %v675_v26, %v674_v11  ;;  %v545_v9 = vmax.f32 %v413_v43, 0.0 }
  0xfe   :  { %v542_v24 = vmax.f32 %v405_v7, 0.0  ;;  %v617_v29 = vadd.f32 %v616_v14, %v615_v17  ;;  %v432_v14 = vpop.f32.mrf.mxu1  ;;  %v681_v15 = vsel %vm592_vm2, %v569_v45, 0.0  ;;  %v546_v20 = vmax.f32 %v415_v4, 0.0 }
  0xff   :  { %v678_v10 = vadd.f32 %v677_v23, %v676_v39  ;;  %v425_v45 = vadd.f32 %v1140_v35, %v1210_v61  ;;  %v745_v39 = vld [vmem:[%s1388_s3 + $0x10] sm:$0xff]  ;;  %v576_v61 = vmax.f32 %v490_v54, 0.0 }
 0x100   :  { %v619_v48 = vadd.f32 %v618_v30, %v617_v29  ;;  %v622_v58 = vsel %vm592_vm2, %v542_v24, 0.0  ;;  %v420_v30 = vadd.f32 %v1140_v35, %v1199_v49  ;;  %767 = vmatpush.msrb.mxu1 %v745_v39 }
 0x101   :  { %v474_v3 = vpop.f32.mrf.mxu2  ;;  %v680_v19 = vadd.f32 %v679_v28, %v678_v10 }
 0x102   :  { %v475_v36 = vadd.f32 %v1140_v35, %v474_v3  ;;  %v485_v3 = vadd.f32 %v1140_v35, %v1155_v47  ;;  %v621_v59 = vadd.f32 %v620_v33, %v619_v48  ;;  %v418_v47 = vadd.f32 %v1140_v35, %v1195_v42  ;;  %v1279_v33 = vpop.f32.mrf.mxu3 }
 0x103   :  { %v407_v13 = vpop.f32.mrf.mxu0  ;;  %v628_v42 = vsel %vm592_vm2, %v545_v9, 0.0  ;;  %v682_v26 = vadd.f32 %v681_v15, %v680_v19  ;;  %v548_v23 = vmax.f32 %v420_v30, 0.0  ;;  %v433_v15 = vadd.f32 %v1140_v35, %v432_v14 }
 0x104   :  { %v408_v18 = vadd.f32 %v1140_v35, %v407_v13  ;;  %v570_v7 = vmax.f32 %v475_v36, 0.0  ;;  %v623_v13 = vadd.f32 %v622_v58, %v621_v59  ;;  %v574_v56 = vmax.f32 %v485_v3, 0.0 }
 0x105   :  { %v547_v36 = vmax.f32 %v418_v47, 0.0  ;;  %v634_v10 = vsel %vm592_vm2, %v548_v23, 0.0  ;;  %v430_v47 = vadd.f32 %v1140_v35, %v1242_v1 }
 0x106   :  { %v543_v38 = vmax.f32 %v408_v18, 0.0  ;;  %v573_v18 = vmax.f32 %v483_v41, 0.0  ;;  %v683_v22 = vsel %vm592_vm2, %v570_v7, 0.0  ;;  %v493_v7 = vadd.f32 %v1140_v35, %v1172_v6  ;;  %v434_v9 = vpop.f32.mrf.mxu1 }
 0x107   :  { %v684_v11 = vadd.f32 %v683_v22, %v682_v26  ;;  %v632_v62 = vsel %vm592_vm2, %v547_v36, 0.0  ;;  %v495_v6 = vadd.f32 %v1140_v35, %v1180_v21  ;;  %v435_v19 = vadd.f32 %v1140_v35, %v434_v9 }
 0x108   :  { %v624_v51 = vsel %vm592_vm2, %v543_v38, 0.0  ;;  %v423_v38 = vadd.f32 %v1140_v35, %v1203_v55  ;;  %v689_v43 = vsel %vm592_vm2, %v573_v18, 0.0  ;;  %v691_v55 = vsel %vm592_vm2, %v574_v56, 0.0 }
 0x109   :  { %v477_v52 = vpop.f32.mrf.mxu2  ;;  %v625_v17 = vadd.f32 %v624_v51, %v623_v13  ;;  %v550_v13 = vmax.f32 %v425_v45, 0.0  ;;  %v577_v14 = vmax.f32 %v493_v7, 0.0  ;;  %v498_v21 = vadd.f32 %v1140_v35, %v1189_v32 }
 0x10a   :  { %v478_v0 = vadd.f32 %v1140_v35, %v477_v52  ;;  %v630_v52 = vsel %vm592_vm2, %v546_v20, 0.0  ;;  %v549_v59 = vmax.f32 %v423_v38, 0.0  ;;  %v1314_v22 = vpop.f32.mrf.mxu3  ;;  %v438_v26 = vadd.f32 %v1140_v35, %v1146_v37 }
 0x10b   :  { %v409_v5 = vpop.f32.mrf.mxu0  ;;  %v578_v38 = vmax.f32 %v495_v6, 0.0  ;;  %v440_v32 = vadd.f32 %v1140_v35, %v1153_v46  ;;  %v697_v54 = vsel %vm592_vm2, %v577_v14, 0.0  ;;  %v503_v37 = vadd.f32 %v1140_v35, %v1197_v44 }
 0x10c   :  { %v410_v8 = vadd.f32 %v1140_v35, %v409_v5  ;;  %v571_v34 = vmax.f32 %v478_v0, 0.0  ;;  %v575_v0 = vmax.f32 %v488_v25, 0.0  ;;  %v428_v5 = vadd.f32 %v1140_v35, %v1220_v12 }
 0x10d   :  { %v636_v18 = vsel %vm592_vm2, %v549_v59, 0.0  ;;  %v552_v25 = vmax.f32 %v430_v47, 0.0  ;;  %v699_v46 = vsel %vm592_vm2, %v578_v38, 0.0  ;;  %v510_v47 = vadd.f32 %v1140_v35, %v1213_v2 }
 0x10e   :  { %v544_v16 = vmax.f32 %v410_v8, 0.0  ;;  %v685_v49 = vsel %vm592_vm2, %v571_v34, 0.0  ;;  %v551_v56 = vmax.f32 %v428_v5, 0.0  ;;  %v693_v1 = vsel %vm592_vm2, %v575_v0, 0.0 }
 0x10f   :  { %v686_v3 = vadd.f32 %v685_v49, %v684_v11  ;;  %v500_v49 = vadd.f32 %v1140_v35, %v1193_v40  ;;  %v642_v23 = vsel %vm592_vm2, %v552_v25, 0.0  ;;  %v443_v40 = vadd.f32 %v1140_v35, %v1159_v53  ;;  %v743_v25 = vld [vmem:[%s1388_s3] sm:$0xff] }
 0x110   :  { %v626_v24 = vsel %vm592_vm2, %v544_v16, 0.0  ;;  %v744_v16 = vld [vmem:[%s1388_s3 + $0x8] sm:$0xff]  ;;  %v445_v5 = vadd.f32 %v1140_v35, %v1165_v60  ;;  %v508_v53 = vadd.f32 %v1140_v35, %v1205_v57  ;;  %v513_v6 = vadd.f32 %v1140_v35, %v1228_v27 }
 0x111   :  { %v627_v29 = vadd.f32 %v626_v24, %v625_v17  ;;  %v479_v63 = vpop.f32.mrf.mxu2  ;;  %768 = vmatpush.msrb.mxu1 %v744_v16  ;;  %v978_v17 = vmov 0.0   ;;  %v638_v24 = vsel %vm592_vm2, %v550_v13, 0.0  ;;  %v515_v2 = vadd.f32 %v1140_v35, %v1251_v31 }
 0x112   :  { %v480_v41 = vadd.f32 %v1140_v35, %v479_v63  ;;  %26 = vst.msk [vmem:[#allocation2] sm:$0x3] %vm25_vm3, %v978_v17  ;;  %v522_v9 = vpop.f32.mrf.mxu3  ;;  %v583_v57 = vmax.f32 %v508_v53, 0.0  ;;  %v518_v27 = vadd.f32 %v1140_v35, %v1279_v33 }
 0x113   :  { %v629_v48 = vadd.f32 %v628_v42, %v627_v29  ;;  %27 = vst [vmem:[%s1389_s5] sm:$0x3] %v978_v17  ;;  %v553_v42 = vmax.f32 %v433_v15, 0.0  ;;  %v695_v29 = vsel %vm592_vm2, %v576_v61, 0.0  ;;  %v581_v61 = vmax.f32 %v503_v37, 0.0  ;;  %769 = vmatpush.msrb.mxu1 %v743_v25 }
 0x114   :  { %v572_v58 = vmax.f32 %v480_v41, 0.0  ;;  %v640_v41 = vsel %vm592_vm2, %v551_v56, 0.0  ;;  %v586_v31 = vmax.f32 %v515_v2, 0.0  ;;  %v523_v33 = vadd.f32 %v1140_v35, %v522_v9 }
 0x115   :  { %v631_v4 = vadd.f32 %v630_v52, %v629_v48  ;;  %v579_v52 = vmax.f32 %v498_v21, 0.0  ;;  %v644_v45 = vsel %vm592_vm2, %v553_v42, 0.0  ;;  %v705_v16 = vsel %vm592_vm2, %v581_v61, 0.0 }
 0x116   :  { %v687_v28 = vsel %vm592_vm2, %v572_v58, 0.0  ;;  %v555_v58 = vmax.f32 %v438_v26, 0.0  ;;  %v709_v21 = vsel %vm592_vm2, %v583_v57, 0.0 }
 0x117   :  { %v633_v51 = vadd.f32 %v632_v62, %v631_v4  ;;  %v688_v8 = vadd.f32 %v687_v28, %v686_v3  ;;  %v580_v3 = vmax.f32 %v500_v49, 0.0  ;;  %v505_v4 = vadd.f32 %v1140_v35, %v1201_v50 }
 0x118   :  { %v556_v62 = vmax.f32 %v440_v32, 0.0  ;;  %v701_v28 = vsel %vm592_vm2, %v579_v52, 0.0  ;;  %v648_v7 = vsel %vm592_vm2, %v555_v58, 0.0  ;;  %v557_v50 = vmax.f32 %v443_v40, 0.0 }
 0x119   :  { %v635_v34 = vadd.f32 %v634_v10, %v633_v51  ;;  %v690_v12 = vadd.f32 %v689_v43, %v688_v8  ;;  %v554_v43 = vmax.f32 %v435_v19, 0.0  ;;  %v703_v10 = vsel %vm592_vm2, %v580_v3, 0.0 }
 0x11a   :  { %v582_v13 = vmax.f32 %v505_v4, 0.0  ;;  %v650_v60 = vsel %vm592_vm2, %v556_v62, 0.0  ;;  %v652_v19 = vsel %vm592_vm2, %v557_v50, 0.0  ;;  %v524_v38 = vpop.f32.mrf.mxu3  ;;  %v715_v32 = vsel %vm592_vm2, %v586_v31, 0.0 }
 0x11b   :  { %v637_v20 = vadd.f32 %v636_v18, %v635_v34  ;;  %v692_v30 = vadd.f32 %v691_v55, %v690_v12  ;;  %v646_v39 = vsel %vm592_vm2, %v554_v43, 0.0  ;;  %v558_v12 = vmax.f32 %v445_v5, 0.0 }
 0x11c   :  { %v707_v17 = vsel %vm592_vm2, %v582_v13, 0.0 }
 0x11d   :  { %v639_v63 = vadd.f32 %v638_v24, %v637_v20  ;;  %v694_v36 = vadd.f32 %v693_v1, %v692_v30  ;;  %v584_v1 = vmax.f32 %v510_v47, 0.0  ;;  %v654_v30 = vsel %vm592_vm2, %v558_v12, 0.0 }
 0x11e   :  { %v585_v24 = vmax.f32 %v513_v6, 0.0 }
 0x11f   :  { %v641_v11 = vadd.f32 %v640_v41, %v639_v63  ;;  %v696_v48 = vadd.f32 %v695_v29, %v694_v36  ;;  %v711_v29 = vsel %vm592_vm2, %v584_v1, 0.0  ;;  %v520_v63 = vadd.f32 %v1140_v35, %v1314_v22 }
 0x120   :  { %v713_v49 = vsel %vm592_vm2, %v585_v24, 0.0  ;;  %v587_v41 = vmax.f32 %v518_v27, 0.0 }
 0x121   :  { %v643_v55 = vadd.f32 %v642_v23, %v641_v11  ;;  %v698_v0 = vadd.f32 %v697_v54, %v696_v48  ;;  %v588_v54 = vmax.f32 %v520_v63, 0.0  ;;  %v525_v11 = vadd.f32 %v1140_v35, %v524_v38 }
 0x122   :  { %v717_v37 = vsel %vm592_vm2, %v587_v41, 0.0  ;;  %v589_v23 = vmax.f32 %v523_v33, 0.0 }
 0x123   :  { %v700_v44 = vadd.f32 %v699_v46, %v698_v0  ;;  %v645_v59 = vadd.f32 %v644_v45, %v643_v55  ;;  %v719_v22 = vsel %vm592_vm2, %v588_v54, 0.0  ;;  %v590_v58 = vmax.f32 %v525_v11, 0.0 }
 0x124   :  { %v721_v0 = vsel %vm592_vm2, %v589_v23, 0.0 }
 0x125   :  { %v702_v51 = vadd.f32 %v701_v28, %v700_v44  ;;  %v647_v8 = vadd.f32 %v646_v39, %v645_v59  ;;  %v723_v3 = vsel %vm592_vm2, %v590_v58, 0.0 }
 0x127   :  { %v704_v15 = vadd.f32 %v703_v10, %v702_v51  ;;  %v649_v34 = vadd.f32 %v648_v7, %v647_v8  ;;  %v591_v7 = vld [vmem:[#allocation2] sm:$0x3] }
 0x128   :  { %v977_v10 = vld [vmem:[%s1387_s4] ss:$0 sm:$0xff] }
 0x129   :  { %v706_v18 = vadd.f32 %v705_v16, %v704_v15  ;;  %v651_v56 = vadd.f32 %v650_v60, %v649_v34 }
 0x12b   :  { %v708_v14 = vadd.f32 %v707_v17, %v706_v18  ;;  %v653_v20 = vadd.f32 %v652_v19, %v651_v56 }
 0x12d   :  { %v710_v42 = vadd.f32 %v709_v21, %v708_v14  ;;  %v655_v26 = vadd.f32 %v654_v30, %v653_v20 }
 0x12f   :  { %v712_v36 = vadd.f32 %v711_v29, %v710_v42  ;;  %v656_v52 = vrot.slane %v655_v26, 4 }
 0x131   :  { %v714_v43 = vadd.f32 %v713_v49, %v712_v36  ;;  %v657_v55 = vadd.f32 %v656_v52, %v655_v26 }
 0x133   :  { %v716_v48 = vadd.f32 %v715_v32, %v714_v43  ;;  %v658_v4 = vrot.slane %v657_v55, 2 }
 0x135   :  { %v718_v45 = vadd.f32 %v717_v37, %v716_v48  ;;  %v659_v35 = vadd.f32 %v658_v4, %v657_v55 }
 0x137   :  { %v720_v40 = vadd.f32 %v719_v22, %v718_v45  ;;  %v660_v5 = vrot.slane %v659_v35, 1 }
 0x139   :  { %v722_v46 = vadd.f32 %v721_v0, %v720_v40  ;;  %v661_v53 = vadd.f32 %v660_v5, %v659_v35 }
 0x13b   :  { %v724_v39 = vadd.f32 %v723_v3, %v722_v46 }
 0x13d   :  { %v725_v62 = vrot.slane %v724_v39, 4 }
 0x13f   :  { %v726_v44 = vadd.f32 %v725_v62, %v724_v39 }
 0x141   :  { %v727_v59 = vrot.slane %v726_v44, 2 }
 0x143   :  { %v728_v28 = vadd.f32 %v727_v59, %v726_v44 }
 0x145   :  { %v729_v61 = vrot.slane %v728_v28, 1 }
 0x147   :  { %v730_v51 = vadd.f32 %v729_v61, %v728_v28 }
 0x149   :  { %v734_v8 = vsel %vm733_vm4, %v730_v51, %v661_v53 }
 0x14a   :  { %v736_v9 = vadd.f32 %v734_v8, %v591_v7 }
 0x14c   :  { %738 = vst.msk [vmem:[#allocation2] sm:$0x3] %vm25_vm3, %v736_v9 }
 0x153   :  { %v742_v50 = vld [vmem:[#allocation2] sm:$0x3] }
 0x154   :  { %939 = vmatmul.msk.f32.vlgmr.msrb.gmra.mxu1 %vm592_vm2, %v742_v50 }
 0x1d1   :  { %v771_v13 = vpop.f32.mrf.mxu1 }
 0x1d2   :  { %v772_v47 = vadd.f32 %v977_v10, %v771_v13 }
 0x1d4   :  { %774 = vst [vmem:[%s1389_s5] sm:$0x3] %v772_v47 }

</bundles_post_ra>
